<compile_context>
chip_gen: v6e
topology: v6e:2x2x1
jax: 0.10.0
libtpu: 0.0.40
codegen_flags: <defaults>
</compile_context>

<pallas_src>
import functools

import jax
import jax.numpy as jnp
from jax import lax
from jax.experimental import pallas as pl
from jax.experimental.pallas import tpu as pltpu

_TILE = 128           # row/column tile edge; lane-dense (multiple of 128)
_POSINF_SUB = 1000.0  # torch.nan_to_num(..., posinf=1000)


def _round_up(x, m):
    return ((x + m - 1) // m) * m


def _block_moments_kernel(rid_ref, cid_ref, vs_ref, zs_ref, vt_ref, zt_ref,
                          out_ref, *, n_rows, inv_scale):
    """Raw moments of one TILE x TILE block of the two L1-distance matrices.

    rid_ref/cid_ref: (P,) int32 SMEM — row / col block id for every grid step.
    vs_ref: (TILE, Dv) row strip of `values`        (VMEM)
    zs_ref: (TILE, Dz) row strip of `z`             (VMEM)
    vt_ref: (Dv, TILE) column strip of `values`.T   (VMEM)
    zt_ref: (Dz, TILE) column strip of `z`.T        (VMEM)
    out_ref: (1, 8, TILE) lane-dense slab; sublane k holds the lane-partial
             sums of moment k (k = 0..4: sa, sb, saa, sbb, sab).
    """
    g = pl.program_id(0)
    tile = vs_ref.shape[0]
    dv_feats = vs_ref.shape[1]
    dz_feats = zs_ref.shape[1]
    n_sub = tile // 8

    row_block = rid_ref[g]
    col_block = cid_ref[g]
    # Off-diagonal blocks stand in for their (skipped) mirror image.
    weight = jnp.where(row_block == col_block,
                       jnp.float32(1.0), jnp.float32(2.0))

    # Column-strip operands are loop-invariant; hoist the loads out of the loop.
    vt = vt_ref[...]
    zt = zt_ref[...]

    needs_mask = (n_rows % tile) != 0          # static Python bool
    if needs_mask:
        col_valid = (lax.broadcasted_iota(jnp.int32, (8, tile), 1)
                     + col_block * tile) < n_rows
        row_iota = lax.broadcasted_iota(jnp.int32, (8, tile), 0)

    def pairwise_l1(rows, cols_t, nfeat):
        # Statically unrolled feature loop: the lane axis stays = TILE so the
        # sub/abs/add stream is full-vreg VPU work and the (8, TILE)
        # accumulator stays in vregs (no VMEM round-trip per feature).
        # TODO(synk): for very large Dv/Dz (>~256) switch to a lax.fori_loop
        # over feature chunks to bound unroll / compile time and vreg pressure.
        acc = jnp.zeros((8, tile), jnp.float32)
        for d in range(nfeat):
            acc = acc + jnp.abs(rows[:, d:d + 1] - cols_t[d:d + 1, :])
        return acc

    def sub_strip(r, carry):
        sa, sb, saa, sbb, sab = carry
        r8 = pl.multiple_of(r * 8, 8)
        rows_v = vs_ref[pl.ds(r8, 8), :]
        rows_z = zs_ref[pl.ds(r8, 8), :]

        a = pairwise_l1(rows_v, vt, dv_feats) * inv_scale   # torch: cdist/25
        b = pairwise_l1(rows_z, zt, dz_feats)

        # torch.nan_to_num parity: distances are sums of |.| so >= 0; only
        # +inf / nan can appear -> two selects instead of a full nan_to_num.
        a = jnp.where(jnp.isnan(a), 0.0,
                      jnp.where(jnp.isinf(a), _POSINF_SUB, a))
        b = jnp.where(jnp.isnan(b), 0.0,
                      jnp.where(jnp.isinf(b), _POSINF_SUB, b))

        if needs_mask:
            # Keep this as a select (not multiply-by-mask) so padded entries
            # can never leak, whatever their value.
            row_valid = (row_iota + (row_block * tile + r8)) < n_rows
            valid = jnp.logical_and(row_valid, col_valid)
            a = jnp.where(valid, a, 0.0)
            b = jnp.where(valid, b, 0.0)

        return (sa + a, sb + b, saa + a * a, sbb + b * b, sab + a * b)

    zero = jnp.zeros((8, tile), jnp.float32)
    sa, sb, saa, sbb, sab = lax.fori_loop(
        0, n_sub, sub_strip, (zero, zero, zero, zero, zero))

    # Sublane-reduce (XLU) to lane-partials; the cross-lane reduction happens
    # in the wrapper.  One store per moment; output stays 128-lane dense.
    out_ref[0, 0:1, :] = jnp.sum(sa, axis=0, keepdims=True) * weight
    out_ref[0, 1:2, :] = jnp.sum(sb, axis=0, keepdims=True) * weight
    out_ref[0, 2:3, :] = jnp.sum(saa, axis=0, keepdims=True) * weight
    out_ref[0, 3:4, :] = jnp.sum(sbb, axis=0, keepdims=True) * weight
    out_ref[0, 4:5, :] = jnp.sum(sab, axis=0, keepdims=True) * weight
    out_ref[0, 5:8, :] = jnp.zeros((3, tile), jnp.float32)


def latent_correlation_loss(values, z):
    """Pallas-backed forward of LatentCorrelationLoss.

    values: (N, Dv), z: (N, Dz). Returns scalar f32 loss = 1 - corr(dv, dz).
    """
    values = jnp.asarray(values, jnp.float32)
    z = jnp.asarray(z, jnp.float32)
    n, dv_feats = values.shape
    nz, dz_feats = z.shape
    assert n == nz, "values and z must have the same number of rows"

    tile = _TILE
    n_pad = _round_up(n, tile)
    num_blocks = n_pad // tile

    # Zero-pad the sample axis to a tile multiple (deterministic data; the
    # in-kernel masks drop every pair that touches a padded row/column).
    v_pad = jnp.pad(values, ((0, n_pad - n), (0, 0)))
    z_pad = jnp.pad(z, ((0, n_pad - n), (0, 0)))
    vt_pad = v_pad.T   # (Dv, n_pad): N on the lane axis inside the kernel
    zt_pad = z_pad.T   # (Dz, n_pad)

    # Upper-triangle tile pairs (symmetry: d(i,j)==d(j,i); diagonal d(i,i)=0).
    pairs = [(bi, bj)
             for bi in range(num_blocks) for bj in range(bi, num_blocks)]
    row_ids = jnp.asarray([p[0] for p in pairs], dtype=jnp.int32)
    col_ids = jnp.asarray([p[1] for p in pairs], dtype=jnp.int32)
    num_pairs = len(pairs)

    flops = (3 * num_pairs * tile * tile * (dv_feats + dz_feats)
             + 10 * num_pairs * tile * tile)
    bytes_accessed = 4 * (2 * n_pad * (dv_feats + dz_feats)
                          + num_pairs * 8 * tile)

    partial = pl.pallas_call(
        functools.partial(_block_moments_kernel,
                          n_rows=n, inv_scale=1.0 / 25.0),
        grid_spec=pltpu.PrefetchScalarGridSpec(
            num_scalar_prefetch=2,
            grid=(num_pairs,),
            in_specs=[
                pl.BlockSpec((tile, dv_feats), lambda g, rid, cid: (rid[g], 0)),
                pl.BlockSpec((tile, dz_feats), lambda g, rid, cid: (rid[g], 0)),
                pl.BlockSpec((dv_feats, tile), lambda g, rid, cid: (0, cid[g])),
                pl.BlockSpec((dz_feats, tile), lambda g, rid, cid: (0, cid[g])),
            ],
            out_specs=pl.BlockSpec((1, 8, tile), lambda g, rid, cid: (g, 0, 0)),
        ),
        out_shape=jax.ShapeDtypeStruct((num_pairs, 8, tile), jnp.float32),
        compiler_params=pltpu.CompilerParams(
            # Tile pairs are fully independent -> megacore-shardable on v7x;
            # a no-op on single-TC v5e/v6e.  Per-step VMEM is a few hundred
            # KiB, so no vmem_limit override is needed on any generation.
            dimension_semantics=("parallel",),
        ),
        cost_estimate=pl.CostEstimate(
            flops=int(flops),
            transcendentals=0,
            bytes_accessed=int(bytes_accessed)),
    )(row_ids, col_ids, v_pad, z_pad, vt_pad, zt_pad)

    # O(1) Pearson finalize on the summed one-pass raw moments.
    # TODO(synk): for N^2 >> 1e7 in f32, a compensated (Kahan) or shifted
    # accumulation would reduce cancellation in saa - sa^2/cnt.
    sums = jnp.sum(partial[:, :5, :], axis=(0, 2))
    sa, sb, saa, sbb, sab = sums[0], sums[1], sums[2], sums[3], sums[4]
    cnt = jnp.float32(n) * jnp.float32(n)
    cov = sab - sa * sb / cnt
    var_a = jnp.maximum(saa - sa * sa / cnt, 0.0)
    var_b = jnp.maximum(sbb - sb * sb / cnt, 0.0)
    denom = jnp.sqrt(var_a * var_b)
    # torch.corrcoef returns NaN for a constant operand; guard instead so the
    # loss stays finite in that degenerate case.
    r = jnp.where(denom > 0.0, cov / denom, jnp.float32(0.0))
    r = jnp.clip(r, -1.0, 1.0)            # torch.corrcoef clamps to [-1, 1]
    return (1.0 - r).astype(jnp.float32)


def _reference_loss(values, z):
    """Pure-JAX reference mirroring the PyTorch math (sanity check)."""
    dv = jnp.sum(jnp.abs(values[:, None, :] - values[None, :, :]), axis=-1) / 25.0
    dz = jnp.sum(jnp.abs(z[:, None, :] - z[None, :, :]), axis=-1)
    dv = jnp.nan_to_num(dv, nan=0.0, posinf=1000.0, neginf=-1000.0)
    dz = jnp.nan_to_num(dz, nan=0.0, posinf=1000.0, neginf=-1000.0)
    a = dv.reshape(-1)
    b = dz.reshape(-1)
    ac = a - a.mean()
    bc = b - b.mean()
    r = jnp.sum(ac * bc) / jnp.sqrt(jnp.sum(ac * ac) * jnp.sum(bc * bc))
    return 1.0 - jnp.clip(r, -1.0, 1.0)


if __name__ == "__main__":
    key = jax.random.PRNGKey(0)
    kv, kz = jax.random.split(key)

    # Small shapes: N=8 samples, 32 function-value features, 8 latent dims.
    values = jax.random.normal(kv, (8, 32), dtype=jnp.float32)
    z = jax.random.normal(kz, (8, 8), dtype=jnp.float32)

    loss = jax.block_until_ready(latent_correlation_loss(values, z))
    ref = jax.block_until_ready(_reference_loss(values, z))

    assert jnp.isfinite(loss), "kernel produced non-finite loss"
    assert jnp.allclose(loss, ref, atol=1e-4, rtol=1e-4), (loss, ref)

    print("KERNEL_OK")
</pallas_src>

<mosaic_0001>
module attributes {stable_mosaic.version = 11 : i64} {
  func.func @_block_moments_kernel(%arg0: i32, %arg1: memref<1xi32, #tpu.memory_space<smem>>, %arg2: memref<1xi32, #tpu.memory_space<smem>>, %arg3: memref<128x32xf32, #tpu.memory_space<vmem>>, %arg4: memref<128x8xf32, #tpu.memory_space<vmem>>, %arg5: memref<32x128xf32, #tpu.memory_space<vmem>>, %arg6: memref<8x128xf32, #tpu.memory_space<vmem>>, %arg7: memref<1x8x128xf32, #tpu.memory_space<vmem>>) attributes {dimension_semantics = [#tpu.dimension_semantics<parallel>], iteration_bounds = array<i64: 1>, scalar_prefetch = 2 : i64, scratch_operands = 0 : i64, tpu.core_type = #tpu.core_type<tc>, window_params = [{transform_indices = @transform_0, window_bounds = array<i64: 128, 32>}, {transform_indices = @transform_1, window_bounds = array<i64: 128, 8>}, {transform_indices = @transform_2, window_bounds = array<i64: 32, 128>}, {transform_indices = @transform_3, window_bounds = array<i64: 8, 128>}, {transform_indices = @transform_4, window_bounds = array<i64: 1, 8, 128>}]} {
    %0 = arith.index_cast %arg0 : i32 to index
    %1 = memref.load %arg1[%0] : memref<1xi32, #tpu.memory_space<smem>>
    %2 = arith.index_cast %arg0 : i32 to index
    %3 = memref.load %arg2[%2] : memref<1xi32, #tpu.memory_space<smem>>
    %4 = arith.cmpi eq, %1, %3 : i32
    %cst = arith.constant 1.000000e+00 : f32
    %cst_0 = arith.constant 2.000000e+00 : f32
    %5 = arith.select %4, %cst, %cst_0 : f32
    %c0 = arith.constant 0 : index
    %c0_1 = arith.constant 0 : index
    %6 = vector.load %arg5[%c0, %c0_1] : memref<32x128xf32, #tpu.memory_space<vmem>>, vector<32x128xf32>
    %c0_2 = arith.constant 0 : index
    %c0_3 = arith.constant 0 : index
    %7 = vector.load %arg6[%c0_2, %c0_3] : memref<8x128xf32, #tpu.memory_space<vmem>>, vector<8x128xf32>
    %8 = tpu.iota {dimensions = array<i32: 1>} : vector<8x128xi32>
    %c128_i32 = arith.constant 128 : i32
    %9 = arith.muli %3, %c128_i32 : i32
    %10 = vector.broadcast %9 : i32 to vector<8x128xi32>
    %11 = arith.addi %8, %10 : vector<8x128xi32>
    %c8_i32 = arith.constant 8 : i32
    %12 = vector.broadcast %c8_i32 : i32 to vector<8x128xi32>
    %13 = arith.cmpi slt, %11, %12 : vector<8x128xi32>
    %14 = tpu.iota {dimensions = array<i32: 0>} : vector<8x128xi32>
    %cst_4 = arith.constant 0.000000e+00 : f32
    %15 = vector.broadcast %cst_4 : f32 to vector<8x128xf32>
    %c0_i32 = arith.constant 0 : i32
    %c16_i32 = arith.constant 16 : i32
    %16 = arith.addi %c0_i32, %c16_i32 : i32
    %c1_i32 = arith.constant 1 : i32
    %17:5 = scf.for %arg8 = %c0_i32 to %16 step %c1_i32 iter_args(%arg9 = %15, %arg10 = %15, %arg11 = %15, %arg12 = %15, %arg13 = %15) -> (vector<8x128xf32>, vector<8x128xf32>, vector<8x128xf32>, vector<8x128xf32>, vector<8x128xf32>)  : i32 {
      %c8_i32_25 = arith.constant 8 : i32
      %57 = arith.muli %arg8, %c8_i32_25 : i32
      %58 = tpu.assume_multiple %57, 8 : i32
      %59 = arith.index_cast %58 : i32 to index
      %c0_26 = arith.constant 0 : index
      %60 = vector.load %arg3[%59, %c0_26] : memref<128x32xf32, #tpu.memory_space<vmem>>, vector<8x32xf32>
      %61 = arith.index_cast %58 : i32 to index
      %c0_27 = arith.constant 0 : index
      %62 = vector.load %arg4[%61, %c0_27] : memref<128x8xf32, #tpu.memory_space<vmem>>, vector<8x8xf32>
      %cst_28 = arith.constant 0.000000e+00 : f32
      %63 = vector.broadcast %cst_28 : f32 to vector<8x128xf32>
      %64 = vector.extract_strided_slice %60 {offsets = [0, 0], sizes = [8, 1], strides = [1, 1]} : vector<8x32xf32> to vector<8x1xf32>
      %65 = vector.extract_strided_slice %6 {offsets = [0, 0], sizes = [1, 128], strides = [1, 1]} : vector<32x128xf32> to vector<1x128xf32>
      %66 = vector.broadcast %64 : vector<8x1xf32> to vector<8x128xf32>
      %67 = vector.broadcast %65 : vector<1x128xf32> to vector<8x128xf32>
      %68 = arith.subf %66, %67 : vector<8x128xf32>
      %69 = math.absf %68 : vector<8x128xf32>
      %70 = arith.addf %63, %69 : vector<8x128xf32>
      %71 = vector.extract_strided_slice %60 {offsets = [0, 1], sizes = [8, 1], strides = [1, 1]} : vector<8x32xf32> to vector<8x1xf32>
      %72 = vector.extract_strided_slice %6 {offsets = [1, 0], sizes = [1, 128], strides = [1, 1]} : vector<32x128xf32> to vector<1x128xf32>
      %73 = vector.broadcast %71 : vector<8x1xf32> to vector<8x128xf32>
      %74 = vector.broadcast %72 : vector<1x128xf32> to vector<8x128xf32>
      %75 = arith.subf %73, %74 : vector<8x128xf32>
      %76 = math.absf %75 : vector<8x128xf32>
      %77 = arith.addf %70, %76 : vector<8x128xf32>
      %78 = vector.extract_strided_slice %60 {offsets = [0, 2], sizes = [8, 1], strides = [1, 1]} : vector<8x32xf32> to vector<8x1xf32>
      %79 = vector.extract_strided_slice %6 {offsets = [2, 0], sizes = [1, 128], strides = [1, 1]} : vector<32x128xf32> to vector<1x128xf32>
      %80 = vector.broadcast %78 : vector<8x1xf32> to vector<8x128xf32>
      %81 = vector.broadcast %79 : vector<1x128xf32> to vector<8x128xf32>
      %82 = arith.subf %80, %81 : vector<8x128xf32>
      %83 = math.absf %82 : vector<8x128xf32>
      %84 = arith.addf %77, %83 : vector<8x128xf32>
      %85 = vector.extract_strided_slice %60 {offsets = [0, 3], sizes = [8, 1], strides = [1, 1]} : vector<8x32xf32> to vector<8x1xf32>
      %86 = vector.extract_strided_slice %6 {offsets = [3, 0], sizes = [1, 128], strides = [1, 1]} : vector<32x128xf32> to vector<1x128xf32>
      %87 = vector.broadcast %85 : vector<8x1xf32> to vector<8x128xf32>
      %88 = vector.broadcast %86 : vector<1x128xf32> to vector<8x128xf32>
      %89 = arith.subf %87, %88 : vector<8x128xf32>
      %90 = math.absf %89 : vector<8x128xf32>
      %91 = arith.addf %84, %90 : vector<8x128xf32>
      %92 = vector.extract_strided_slice %60 {offsets = [0, 4], sizes = [8, 1], strides = [1, 1]} : vector<8x32xf32> to vector<8x1xf32>
      %93 = vector.extract_strided_slice %6 {offsets = [4, 0], sizes = [1, 128], strides = [1, 1]} : vector<32x128xf32> to vector<1x128xf32>
      %94 = vector.broadcast %92 : vector<8x1xf32> to vector<8x128xf32>
      %95 = vector.broadcast %93 : vector<1x128xf32> to vector<8x128xf32>
      %96 = arith.subf %94, %95 : vector<8x128xf32>
      %97 = math.absf %96 : vector<8x128xf32>
      %98 = arith.addf %91, %97 : vector<8x128xf32>
      %99 = vector.extract_strided_slice %60 {offsets = [0, 5], sizes = [8, 1], strides = [1, 1]} : vector<8x32xf32> to vector<8x1xf32>
      %100 = vector.extract_strided_slice %6 {offsets = [5, 0], sizes = [1, 128], strides = [1, 1]} : vector<32x128xf32> to vector<1x128xf32>
      %101 = vector.broadcast %99 : vector<8x1xf32> to vector<8x128xf32>
      %102 = vector.broadcast %100 : vector<1x128xf32> to vector<8x128xf32>
      %103 = arith.subf %101, %102 : vector<8x128xf32>
      %104 = math.absf %103 : vector<8x128xf32>
      %105 = arith.addf %98, %104 : vector<8x128xf32>
      %106 = vector.extract_strided_slice %60 {offsets = [0, 6], sizes = [8, 1], strides = [1, 1]} : vector<8x32xf32> to vector<8x1xf32>
      %107 = vector.extract_strided_slice %6 {offsets = [6, 0], sizes = [1, 128], strides = [1, 1]} : vector<32x128xf32> to vector<1x128xf32>
      %108 = vector.broadcast %106 : vector<8x1xf32> to vector<8x128xf32>
      %109 = vector.broadcast %107 : vector<1x128xf32> to vector<8x128xf32>
      %110 = arith.subf %108, %109 : vector<8x128xf32>
      %111 = math.absf %110 : vector<8x128xf32>
      %112 = arith.addf %105, %111 : vector<8x128xf32>
      %113 = vector.extract_strided_slice %60 {offsets = [0, 7], sizes = [8, 1], strides = [1, 1]} : vector<8x32xf32> to vector<8x1xf32>
      %114 = vector.extract_strided_slice %6 {offsets = [7, 0], sizes = [1, 128], strides = [1, 1]} : vector<32x128xf32> to vector<1x128xf32>
      %115 = vector.broadcast %113 : vector<8x1xf32> to vector<8x128xf32>
      %116 = vector.broadcast %114 : vector<1x128xf32> to vector<8x128xf32>
      %117 = arith.subf %115, %116 : vector<8x128xf32>
      %118 = math.absf %117 : vector<8x128xf32>
      %119 = arith.addf %112, %118 : vector<8x128xf32>
      %120 = vector.extract_strided_slice %60 {offsets = [0, 8], sizes = [8, 1], strides = [1, 1]} : vector<8x32xf32> to vector<8x1xf32>
      %121 = vector.extract_strided_slice %6 {offsets = [8, 0], sizes = [1, 128], strides = [1, 1]} : vector<32x128xf32> to vector<1x128xf32>
      %122 = vector.broadcast %120 : vector<8x1xf32> to vector<8x128xf32>
      %123 = vector.broadcast %121 : vector<1x128xf32> to vector<8x128xf32>
      %124 = arith.subf %122, %123 : vector<8x128xf32>
      %125 = math.absf %124 : vector<8x128xf32>
      %126 = arith.addf %119, %125 : vector<8x128xf32>
      %127 = vector.extract_strided_slice %60 {offsets = [0, 9], sizes = [8, 1], strides = [1, 1]} : vector<8x32xf32> to vector<8x1xf32>
      %128 = vector.extract_strided_slice %6 {offsets = [9, 0], sizes = [1, 128], strides = [1, 1]} : vector<32x128xf32> to vector<1x128xf32>
      %129 = vector.broadcast %127 : vector<8x1xf32> to vector<8x128xf32>
      %130 = vector.broadcast %128 : vector<1x128xf32> to vector<8x128xf32>
      %131 = arith.subf %129, %130 : vector<8x128xf32>
      %132 = math.absf %131 : vector<8x128xf32>
      %133 = arith.addf %126, %132 : vector<8x128xf32>
      %134 = vector.extract_strided_slice %60 {offsets = [0, 10], sizes = [8, 1], strides = [1, 1]} : vector<8x32xf32> to vector<8x1xf32>
      %135 = vector.extract_strided_slice %6 {offsets = [10, 0], sizes = [1, 128], strides = [1, 1]} : vector<32x128xf32> to vector<1x128xf32>
      %136 = vector.broadcast %134 : vector<8x1xf32> to vector<8x128xf32>
      %137 = vector.broadcast %135 : vector<1x128xf32> to vector<8x128xf32>
      %138 = arith.subf %136, %137 : vector<8x128xf32>
      %139 = math.absf %138 : vector<8x128xf32>
      %140 = arith.addf %133, %139 : vector<8x128xf32>
      %141 = vector.extract_strided_slice %60 {offsets = [0, 11], sizes = [8, 1], strides = [1, 1]} : vector<8x32xf32> to vector<8x1xf32>
      %142 = vector.extract_strided_slice %6 {offsets = [11, 0], sizes = [1, 128], strides = [1, 1]} : vector<32x128xf32> to vector<1x128xf32>
      %143 = vector.broadcast %141 : vector<8x1xf32> to vector<8x128xf32>
      %144 = vector.broadcast %142 : vector<1x128xf32> to vector<8x128xf32>
      %145 = arith.subf %143, %144 : vector<8x128xf32>
      %146 = math.absf %145 : vector<8x128xf32>
      %147 = arith.addf %140, %146 : vector<8x128xf32>
      %148 = vector.extract_strided_slice %60 {offsets = [0, 12], sizes = [8, 1], strides = [1, 1]} : vector<8x32xf32> to vector<8x1xf32>
      %149 = vector.extract_strided_slice %6 {offsets = [12, 0], sizes = [1, 128], strides = [1, 1]} : vector<32x128xf32> to vector<1x128xf32>
      %150 = vector.broadcast %148 : vector<8x1xf32> to vector<8x128xf32>
      %151 = vector.broadcast %149 : vector<1x128xf32> to vector<8x128xf32>
      %152 = arith.subf %150, %151 : vector<8x128xf32>
      %153 = math.absf %152 : vector<8x128xf32>
      %154 = arith.addf %147, %153 : vector<8x128xf32>
      %155 = vector.extract_strided_slice %60 {offsets = [0, 13], sizes = [8, 1], strides = [1, 1]} : vector<8x32xf32> to vector<8x1xf32>
      %156 = vector.extract_strided_slice %6 {offsets = [13, 0], sizes = [1, 128], strides = [1, 1]} : vector<32x128xf32> to vector<1x128xf32>
      %157 = vector.broadcast %155 : vector<8x1xf32> to vector<8x128xf32>
      %158 = vector.broadcast %156 : vector<1x128xf32> to vector<8x128xf32>
      %159 = arith.subf %157, %158 : vector<8x128xf32>
      %160 = math.absf %159 : vector<8x128xf32>
      %161 = arith.addf %154, %160 : vector<8x128xf32>
      %162 = vector.extract_strided_slice %60 {offsets = [0, 14], sizes = [8, 1], strides = [1, 1]} : vector<8x32xf32> to vector<8x1xf32>
      %163 = vector.extract_strided_slice %6 {offsets = [14, 0], sizes = [1, 128], strides = [1, 1]} : vector<32x128xf32> to vector<1x128xf32>
      %164 = vector.broadcast %162 : vector<8x1xf32> to vector<8x128xf32>
      %165 = vector.broadcast %163 : vector<1x128xf32> to vector<8x128xf32>
      %166 = arith.subf %164, %165 : vector<8x128xf32>
      %167 = math.absf %166 : vector<8x128xf32>
      %168 = arith.addf %161, %167 : vector<8x128xf32>
      %169 = vector.extract_strided_slice %60 {offsets = [0, 15], sizes = [8, 1], strides = [1, 1]} : vector<8x32xf32> to vector<8x1xf32>
      %170 = vector.extract_strided_slice %6 {offsets = [15, 0], sizes = [1, 128], strides = [1, 1]} : vector<32x128xf32> to vector<1x128xf32>
      %171 = vector.broadcast %169 : vector<8x1xf32> to vector<8x128xf32>
      %172 = vector.broadcast %170 : vector<1x128xf32> to vector<8x128xf32>
      %173 = arith.subf %171, %172 : vector<8x128xf32>
      %174 = math.absf %173 : vector<8x128xf32>
      %175 = arith.addf %168, %174 : vector<8x128xf32>
      %176 = vector.extract_strided_slice %60 {offsets = [0, 16], sizes = [8, 1], strides = [1, 1]} : vector<8x32xf32> to vector<8x1xf32>
      %177 = vector.extract_strided_slice %6 {offsets = [16, 0], sizes = [1, 128], strides = [1, 1]} : vector<32x128xf32> to vector<1x128xf32>
      %178 = vector.broadcast %176 : vector<8x1xf32> to vector<8x128xf32>
      %179 = vector.broadcast %177 : vector<1x128xf32> to vector<8x128xf32>
      %180 = arith.subf %178, %179 : vector<8x128xf32>
      %181 = math.absf %180 : vector<8x128xf32>
      %182 = arith.addf %175, %181 : vector<8x128xf32>
      %183 = vector.extract_strided_slice %60 {offsets = [0, 17], sizes = [8, 1], strides = [1, 1]} : vector<8x32xf32> to vector<8x1xf32>
      %184 = vector.extract_strided_slice %6 {offsets = [17, 0], sizes = [1, 128], strides = [1, 1]} : vector<32x128xf32> to vector<1x128xf32>
      %185 = vector.broadcast %183 : vector<8x1xf32> to vector<8x128xf32>
      %186 = vector.broadcast %184 : vector<1x128xf32> to vector<8x128xf32>
      %187 = arith.subf %185, %186 : vector<8x128xf32>
      %188 = math.absf %187 : vector<8x128xf32>
      %189 = arith.addf %182, %188 : vector<8x128xf32>
      %190 = vector.extract_strided_slice %60 {offsets = [0, 18], sizes = [8, 1], strides = [1, 1]} : vector<8x32xf32> to vector<8x1xf32>
      %191 = vector.extract_strided_slice %6 {offsets = [18, 0], sizes = [1, 128], strides = [1, 1]} : vector<32x128xf32> to vector<1x128xf32>
      %192 = vector.broadcast %190 : vector<8x1xf32> to vector<8x128xf32>
      %193 = vector.broadcast %191 : vector<1x128xf32> to vector<8x128xf32>
      %194 = arith.subf %192, %193 : vector<8x128xf32>
      %195 = math.absf %194 : vector<8x128xf32>
      %196 = arith.addf %189, %195 : vector<8x128xf32>
      %197 = vector.extract_strided_slice %60 {offsets = [0, 19], sizes = [8, 1], strides = [1, 1]} : vector<8x32xf32> to vector<8x1xf32>
      %198 = vector.extract_strided_slice %6 {offsets = [19, 0], sizes = [1, 128], strides = [1, 1]} : vector<32x128xf32> to vector<1x128xf32>
      %199 = vector.broadcast %197 : vector<8x1xf32> to vector<8x128xf32>
      %200 = vector.broadcast %198 : vector<1x128xf32> to vector<8x128xf32>
      %201 = arith.subf %199, %200 : vector<8x128xf32>
      %202 = math.absf %201 : vector<8x128xf32>
      %203 = arith.addf %196, %202 : vector<8x128xf32>
      %204 = vector.extract_strided_slice %60 {offsets = [0, 20], sizes = [8, 1], strides = [1, 1]} : vector<8x32xf32> to vector<8x1xf32>
      %205 = vector.extract_strided_slice %6 {offsets = [20, 0], sizes = [1, 128], strides = [1, 1]} : vector<32x128xf32> to vector<1x128xf32>
      %206 = vector.broadcast %204 : vector<8x1xf32> to vector<8x128xf32>
      %207 = vector.broadcast %205 : vector<1x128xf32> to vector<8x128xf32>
      %208 = arith.subf %206, %207 : vector<8x128xf32>
      %209 = math.absf %208 : vector<8x128xf32>
      %210 = arith.addf %203, %209 : vector<8x128xf32>
      %211 = vector.extract_strided_slice %60 {offsets = [0, 21], sizes = [8, 1], strides = [1, 1]} : vector<8x32xf32> to vector<8x1xf32>
      %212 = vector.extract_strided_slice %6 {offsets = [21, 0], sizes = [1, 128], strides = [1, 1]} : vector<32x128xf32> to vector<1x128xf32>
      %213 = vector.broadcast %211 : vector<8x1xf32> to vector<8x128xf32>
      %214 = vector.broadcast %212 : vector<1x128xf32> to vector<8x128xf32>
      %215 = arith.subf %213, %214 : vector<8x128xf32>
      %216 = math.absf %215 : vector<8x128xf32>
      %217 = arith.addf %210, %216 : vector<8x128xf32>
      %218 = vector.extract_strided_slice %60 {offsets = [0, 22], sizes = [8, 1], strides = [1, 1]} : vector<8x32xf32> to vector<8x1xf32>
      %219 = vector.extract_strided_slice %6 {offsets = [22, 0], sizes = [1, 128], strides = [1, 1]} : vector<32x128xf32> to vector<1x128xf32>
      %220 = vector.broadcast %218 : vector<8x1xf32> to vector<8x128xf32>
      %221 = vector.broadcast %219 : vector<1x128xf32> to vector<8x128xf32>
      %222 = arith.subf %220, %221 : vector<8x128xf32>
      %223 = math.absf %222 : vector<8x128xf32>
      %224 = arith.addf %217, %223 : vector<8x128xf32>
      %225 = vector.extract_strided_slice %60 {offsets = [0, 23], sizes = [8, 1], strides = [1, 1]} : vector<8x32xf32> to vector<8x1xf32>
      %226 = vector.extract_strided_slice %6 {offsets = [23, 0], sizes = [1, 128], strides = [1, 1]} : vector<32x128xf32> to vector<1x128xf32>
      %227 = vector.broadcast %225 : vector<8x1xf32> to vector<8x128xf32>
      %228 = vector.broadcast %226 : vector<1x128xf32> to vector<8x128xf32>
      %229 = arith.subf %227, %228 : vector<8x128xf32>
      %230 = math.absf %229 : vector<8x128xf32>
      %231 = arith.addf %224, %230 : vector<8x128xf32>
      %232 = vector.extract_strided_slice %60 {offsets = [0, 24], sizes = [8, 1], strides = [1, 1]} : vector<8x32xf32> to vector<8x1xf32>
      %233 = vector.extract_strided_slice %6 {offsets = [24, 0], sizes = [1, 128], strides = [1, 1]} : vector<32x128xf32> to vector<1x128xf32>
      %234 = vector.broadcast %232 : vector<8x1xf32> to vector<8x128xf32>
      %235 = vector.broadcast %233 : vector<1x128xf32> to vector<8x128xf32>
      %236 = arith.subf %234, %235 : vector<8x128xf32>
      %237 = math.absf %236 : vector<8x128xf32>
      %238 = arith.addf %231, %237 : vector<8x128xf32>
      %239 = vector.extract_strided_slice %60 {offsets = [0, 25], sizes = [8, 1], strides = [1, 1]} : vector<8x32xf32> to vector<8x1xf32>
      %240 = vector.extract_strided_slice %6 {offsets = [25, 0], sizes = [1, 128], strides = [1, 1]} : vector<32x128xf32> to vector<1x128xf32>
      %241 = vector.broadcast %239 : vector<8x1xf32> to vector<8x128xf32>
      %242 = vector.broadcast %240 : vector<1x128xf32> to vector<8x128xf32>
      %243 = arith.subf %241, %242 : vector<8x128xf32>
      %244 = math.absf %243 : vector<8x128xf32>
      %245 = arith.addf %238, %244 : vector<8x128xf32>
      %246 = vector.extract_strided_slice %60 {offsets = [0, 26], sizes = [8, 1], strides = [1, 1]} : vector<8x32xf32> to vector<8x1xf32>
      %247 = vector.extract_strided_slice %6 {offsets = [26, 0], sizes = [1, 128], strides = [1, 1]} : vector<32x128xf32> to vector<1x128xf32>
      %248 = vector.broadcast %246 : vector<8x1xf32> to vector<8x128xf32>
      %249 = vector.broadcast %247 : vector<1x128xf32> to vector<8x128xf32>
      %250 = arith.subf %248, %249 : vector<8x128xf32>
      %251 = math.absf %250 : vector<8x128xf32>
      %252 = arith.addf %245, %251 : vector<8x128xf32>
      %253 = vector.extract_strided_slice %60 {offsets = [0, 27], sizes = [8, 1], strides = [1, 1]} : vector<8x32xf32> to vector<8x1xf32>
      %254 = vector.extract_strided_slice %6 {offsets = [27, 0], sizes = [1, 128], strides = [1, 1]} : vector<32x128xf32> to vector<1x128xf32>
      %255 = vector.broadcast %253 : vector<8x1xf32> to vector<8x128xf32>
      %256 = vector.broadcast %254 : vector<1x128xf32> to vector<8x128xf32>
      %257 = arith.subf %255, %256 : vector<8x128xf32>
      %258 = math.absf %257 : vector<8x128xf32>
      %259 = arith.addf %252, %258 : vector<8x128xf32>
      %260 = vector.extract_strided_slice %60 {offsets = [0, 28], sizes = [8, 1], strides = [1, 1]} : vector<8x32xf32> to vector<8x1xf32>
      %261 = vector.extract_strided_slice %6 {offsets = [28, 0], sizes = [1, 128], strides = [1, 1]} : vector<32x128xf32> to vector<1x128xf32>
      %262 = vector.broadcast %260 : vector<8x1xf32> to vector<8x128xf32>
      %263 = vector.broadcast %261 : vector<1x128xf32> to vector<8x128xf32>
      %264 = arith.subf %262, %263 : vector<8x128xf32>
      %265 = math.absf %264 : vector<8x128xf32>
      %266 = arith.addf %259, %265 : vector<8x128xf32>
      %267 = vector.extract_strided_slice %60 {offsets = [0, 29], sizes = [8, 1], strides = [1, 1]} : vector<8x32xf32> to vector<8x1xf32>
      %268 = vector.extract_strided_slice %6 {offsets = [29, 0], sizes = [1, 128], strides = [1, 1]} : vector<32x128xf32> to vector<1x128xf32>
      %269 = vector.broadcast %267 : vector<8x1xf32> to vector<8x128xf32>
      %270 = vector.broadcast %268 : vector<1x128xf32> to vector<8x128xf32>
      %271 = arith.subf %269, %270 : vector<8x128xf32>
      %272 = math.absf %271 : vector<8x128xf32>
      %273 = arith.addf %266, %272 : vector<8x128xf32>
      %274 = vector.extract_strided_slice %60 {offsets = [0, 30], sizes = [8, 1], strides = [1, 1]} : vector<8x32xf32> to vector<8x1xf32>
      %275 = vector.extract_strided_slice %6 {offsets = [30, 0], sizes = [1, 128], strides = [1, 1]} : vector<32x128xf32> to vector<1x128xf32>
      %276 = vector.broadcast %274 : vector<8x1xf32> to vector<8x128xf32>
      %277 = vector.broadcast %275 : vector<1x128xf32> to vector<8x128xf32>
      %278 = arith.subf %276, %277 : vector<8x128xf32>
      %279 = math.absf %278 : vector<8x128xf32>
      %280 = arith.addf %273, %279 : vector<8x128xf32>
      %281 = vector.extract_strided_slice %60 {offsets = [0, 31], sizes = [8, 1], strides = [1, 1]} : vector<8x32xf32> to vector<8x1xf32>
      %282 = vector.extract_strided_slice %6 {offsets = [31, 0], sizes = [1, 128], strides = [1, 1]} : vector<32x128xf32> to vector<1x128xf32>
      %283 = vector.broadcast %281 : vector<8x1xf32> to vector<8x128xf32>
      %284 = vector.broadcast %282 : vector<1x128xf32> to vector<8x128xf32>
      %285 = arith.subf %283, %284 : vector<8x128xf32>
      %286 = math.absf %285 : vector<8x128xf32>
      %287 = arith.addf %280, %286 : vector<8x128xf32>
      %cst_29 = arith.constant 4.000000e-02 : f32
      %288 = vector.broadcast %cst_29 : f32 to vector<8x128xf32>
      %289 = arith.mulf %287, %288 : vector<8x128xf32>
      %cst_30 = arith.constant 0.000000e+00 : f32
      %290 = vector.broadcast %cst_30 : f32 to vector<8x128xf32>
      %291 = vector.extract_strided_slice %62 {offsets = [0, 0], sizes = [8, 1], strides = [1, 1]} : vector<8x8xf32> to vector<8x1xf32>
      %292 = vector.extract_strided_slice %7 {offsets = [0, 0], sizes = [1, 128], strides = [1, 1]} : vector<8x128xf32> to vector<1x128xf32>
      %293 = vector.broadcast %291 : vector<8x1xf32> to vector<8x128xf32>
      %294 = vector.broadcast %292 : vector<1x128xf32> to vector<8x128xf32>
      %295 = arith.subf %293, %294 : vector<8x128xf32>
      %296 = math.absf %295 : vector<8x128xf32>
      %297 = arith.addf %290, %296 : vector<8x128xf32>
      %298 = vector.extract_strided_slice %62 {offsets = [0, 1], sizes = [8, 1], strides = [1, 1]} : vector<8x8xf32> to vector<8x1xf32>
      %299 = vector.extract_strided_slice %7 {offsets = [1, 0], sizes = [1, 128], strides = [1, 1]} : vector<8x128xf32> to vector<1x128xf32>
      %300 = vector.broadcast %298 : vector<8x1xf32> to vector<8x128xf32>
      %301 = vector.broadcast %299 : vector<1x128xf32> to vector<8x128xf32>
      %302 = arith.subf %300, %301 : vector<8x128xf32>
      %303 = math.absf %302 : vector<8x128xf32>
      %304 = arith.addf %297, %303 : vector<8x128xf32>
      %305 = vector.extract_strided_slice %62 {offsets = [0, 2], sizes = [8, 1], strides = [1, 1]} : vector<8x8xf32> to vector<8x1xf32>
      %306 = vector.extract_strided_slice %7 {offsets = [2, 0], sizes = [1, 128], strides = [1, 1]} : vector<8x128xf32> to vector<1x128xf32>
      %307 = vector.broadcast %305 : vector<8x1xf32> to vector<8x128xf32>
      %308 = vector.broadcast %306 : vector<1x128xf32> to vector<8x128xf32>
      %309 = arith.subf %307, %308 : vector<8x128xf32>
      %310 = math.absf %309 : vector<8x128xf32>
      %311 = arith.addf %304, %310 : vector<8x128xf32>
      %312 = vector.extract_strided_slice %62 {offsets = [0, 3], sizes = [8, 1], strides = [1, 1]} : vector<8x8xf32> to vector<8x1xf32>
      %313 = vector.extract_strided_slice %7 {offsets = [3, 0], sizes = [1, 128], strides = [1, 1]} : vector<8x128xf32> to vector<1x128xf32>
      %314 = vector.broadcast %312 : vector<8x1xf32> to vector<8x128xf32>
      %315 = vector.broadcast %313 : vector<1x128xf32> to vector<8x128xf32>
      %316 = arith.subf %314, %315 : vector<8x128xf32>
      %317 = math.absf %316 : vector<8x128xf32>
      %318 = arith.addf %311, %317 : vector<8x128xf32>
      %319 = vector.extract_strided_slice %62 {offsets = [0, 4], sizes = [8, 1], strides = [1, 1]} : vector<8x8xf32> to vector<8x1xf32>
      %320 = vector.extract_strided_slice %7 {offsets = [4, 0], sizes = [1, 128], strides = [1, 1]} : vector<8x128xf32> to vector<1x128xf32>
      %321 = vector.broadcast %319 : vector<8x1xf32> to vector<8x128xf32>
      %322 = vector.broadcast %320 : vector<1x128xf32> to vector<8x128xf32>
      %323 = arith.subf %321, %322 : vector<8x128xf32>
      %324 = math.absf %323 : vector<8x128xf32>
      %325 = arith.addf %318, %324 : vector<8x128xf32>
      %326 = vector.extract_strided_slice %62 {offsets = [0, 5], sizes = [8, 1], strides = [1, 1]} : vector<8x8xf32> to vector<8x1xf32>
      %327 = vector.extract_strided_slice %7 {offsets = [5, 0], sizes = [1, 128], strides = [1, 1]} : vector<8x128xf32> to vector<1x128xf32>
      %328 = vector.broadcast %326 : vector<8x1xf32> to vector<8x128xf32>
      %329 = vector.broadcast %327 : vector<1x128xf32> to vector<8x128xf32>
      %330 = arith.subf %328, %329 : vector<8x128xf32>
      %331 = math.absf %330 : vector<8x128xf32>
      %332 = arith.addf %325, %331 : vector<8x128xf32>
      %333 = vector.extract_strided_slice %62 {offsets = [0, 6], sizes = [8, 1], strides = [1, 1]} : vector<8x8xf32> to vector<8x1xf32>
      %334 = vector.extract_strided_slice %7 {offsets = [6, 0], sizes = [1, 128], strides = [1, 1]} : vector<8x128xf32> to vector<1x128xf32>
      %335 = vector.broadcast %333 : vector<8x1xf32> to vector<8x128xf32>
      %336 = vector.broadcast %334 : vector<1x128xf32> to vector<8x128xf32>
      %337 = arith.subf %335, %336 : vector<8x128xf32>
      %338 = math.absf %337 : vector<8x128xf32>
      %339 = arith.addf %332, %338 : vector<8x128xf32>
      %340 = vector.extract_strided_slice %62 {offsets = [0, 7], sizes = [8, 1], strides = [1, 1]} : vector<8x8xf32> to vector<8x1xf32>
      %341 = vector.extract_strided_slice %7 {offsets = [7, 0], sizes = [1, 128], strides = [1, 1]} : vector<8x128xf32> to vector<1x128xf32>
      %342 = vector.broadcast %340 : vector<8x1xf32> to vector<8x128xf32>
      %343 = vector.broadcast %341 : vector<1x128xf32> to vector<8x128xf32>
      %344 = arith.subf %342, %343 : vector<8x128xf32>
      %345 = math.absf %344 : vector<8x128xf32>
      %346 = arith.addf %339, %345 : vector<8x128xf32>
      %347 = arith.cmpf one, %289, %289 : vector<8x128xf32>
      %348 = math.absf %289 : vector<8x128xf32>
      %cst_31 = arith.constant 0x7F800000 : f32
      %349 = vector.broadcast %cst_31 : f32 to vector<8x128xf32>
      %350 = arith.cmpf oeq, %348, %349 : vector<8x128xf32>
      %cst_32 = arith.constant 1.000000e+03 : f32
      %351 = vector.broadcast %cst_32 : f32 to vector<8x128xf32>
      %352 = arith.select %350, %351, %289 : vector<8x128xi1>, vector<8x128xf32>
      %cst_33 = arith.constant 0.000000e+00 : f32
      %353 = vector.broadcast %cst_33 : f32 to vector<8x128xf32>
      %354 = arith.select %347, %353, %352 : vector<8x128xi1>, vector<8x128xf32>
      %355 = arith.cmpf one, %346, %346 : vector<8x128xf32>
      %356 = math.absf %346 : vector<8x128xf32>
      %cst_34 = arith.constant 0x7F800000 : f32
      %357 = vector.broadcast %cst_34 : f32 to vector<8x128xf32>
      %358 = arith.cmpf oeq, %356, %357 : vector<8x128xf32>
      %cst_35 = arith.constant 1.000000e+03 : f32
      %359 = vector.broadcast %cst_35 : f32 to vector<8x128xf32>
      %360 = arith.select %358, %359, %346 : vector<8x128xi1>, vector<8x128xf32>
      %cst_36 = arith.constant 0.000000e+00 : f32
      %361 = vector.broadcast %cst_36 : f32 to vector<8x128xf32>
      %362 = arith.select %355, %361, %360 : vector<8x128xi1>, vector<8x128xf32>
      %c128_i32_37 = arith.constant 128 : i32
      %363 = arith.muli %1, %c128_i32_37 : i32
      %364 = arith.addi %363, %58 : i32
      %365 = vector.broadcast %364 : i32 to vector<8x128xi32>
      %366 = arith.addi %14, %365 : vector<8x128xi32>
      %c8_i32_38 = arith.constant 8 : i32
      %367 = vector.broadcast %c8_i32_38 : i32 to vector<8x128xi32>
      %368 = arith.cmpi slt, %366, %367 : vector<8x128xi32>
      %369 = arith.andi %368, %13 : vector<8x128xi1>
      %cst_39 = arith.constant 0.000000e+00 : f32
      %370 = vector.broadcast %cst_39 : f32 to vector<8x128xf32>
      %371 = arith.select %369, %354, %370 : vector<8x128xi1>, vector<8x128xf32>
      %cst_40 = arith.constant 0.000000e+00 : f32
      %372 = vector.broadcast %cst_40 : f32 to vector<8x128xf32>
      %373 = arith.select %369, %362, %372 : vector<8x128xi1>, vector<8x128xf32>
      %374 = arith.addf %arg9, %371 : vector<8x128xf32>
      %375 = arith.addf %arg10, %373 : vector<8x128xf32>
      %376 = arith.mulf %371, %371 : vector<8x128xf32>
      %377 = arith.addf %arg11, %376 : vector<8x128xf32>
      %378 = arith.mulf %373, %373 : vector<8x128xf32>
      %379 = arith.addf %arg12, %378 : vector<8x128xf32>
      %380 = arith.mulf %371, %373 : vector<8x128xf32>
      %381 = arith.addf %arg13, %380 : vector<8x128xf32>
      scf.yield %374, %375, %377, %379, %381 : vector<8x128xf32>, vector<8x128xf32>, vector<8x128xf32>, vector<8x128xf32>, vector<8x128xf32>
    }
    %c16_i32_5 = arith.constant 16 : i32
    %cst_6 = arith.constant dense<0.000000e+00> : vector<128xf32>
    %18 = vector.multi_reduction <add>, %17#0, %cst_6 [0] : vector<8x128xf32> to vector<128xf32>
    %19 = vector.shape_cast %18 : vector<128xf32> to vector<1x128xf32>
    %20 = vector.broadcast %5 : f32 to vector<1x128xf32>
    %21 = arith.mulf %19, %20 : vector<1x128xf32>
    %c0_7 = arith.constant 0 : index
    %c0_8 = arith.constant 0 : index
    %c0_9 = arith.constant 0 : index
    %22 = vector.load %arg7[%c0_7, %c0_8, %c0_9] : memref<1x8x128xf32, #tpu.memory_space<vmem>>, vector<1x1x128xf32>
    %23 = vector.shape_cast %22 : vector<1x1x128xf32> to vector<1x128xf32>
    %24 = vector.shape_cast %21 : vector<1x128xf32> to vector<1x1x128xf32>
    tpu.vector_store %arg7[%c0_7, %c0_8, %c0_9], %24 {strides = array<i32>} : memref<1x8x128xf32, #tpu.memory_space<vmem>>, vector<1x1x128xf32>,
    %cst_10 = arith.constant dense<0.000000e+00> : vector<128xf32>
    %25 = vector.multi_reduction <add>, %17#1, %cst_10 [0] : vector<8x128xf32> to vector<128xf32>
    %26 = vector.shape_cast %25 : vector<128xf32> to vector<1x128xf32>
    %27 = vector.broadcast %5 : f32 to vector<1x128xf32>
    %28 = arith.mulf %26, %27 : vector<1x128xf32>
    %c0_11 = arith.constant 0 : index
    %c1 = arith.constant 1 : index
    %c0_12 = arith.constant 0 : index
    %29 = vector.load %arg7[%c0_11, %c1, %c0_12] : memref<1x8x128xf32, #tpu.memory_space<vmem>>, vector<1x1x128xf32>
    %30 = vector.shape_cast %29 : vector<1x1x128xf32> to vector<1x128xf32>
    %31 = vector.shape_cast %28 : vector<1x128xf32> to vector<1x1x128xf32>
    tpu.vector_store %arg7[%c0_11, %c1, %c0_12], %31 {strides = array<i32>} : memref<1x8x128xf32, #tpu.memory_space<vmem>>, vector<1x1x128xf32>,
    %cst_13 = arith.constant dense<0.000000e+00> : vector<128xf32>
    %32 = vector.multi_reduction <add>, %17#2, %cst_13 [0] : vector<8x128xf32> to vector<128xf32>
    %33 = vector.shape_cast %32 : vector<128xf32> to vector<1x128xf32>
    %34 = vector.broadcast %5 : f32 to vector<1x128xf32>
    %35 = arith.mulf %33, %34 : vector<1x128xf32>
    %c0_14 = arith.constant 0 : index
    %c2 = arith.constant 2 : index
    %c0_15 = arith.constant 0 : index
    %36 = vector.load %arg7[%c0_14, %c2, %c0_15] : memref<1x8x128xf32, #tpu.memory_space<vmem>>, vector<1x1x128xf32>
    %37 = vector.shape_cast %36 : vector<1x1x128xf32> to vector<1x128xf32>
    %38 = vector.shape_cast %35 : vector<1x128xf32> to vector<1x1x128xf32>
    tpu.vector_store %arg7[%c0_14, %c2, %c0_15], %38 {strides = array<i32>} : memref<1x8x128xf32, #tpu.memory_space<vmem>>, vector<1x1x128xf32>,
    %cst_16 = arith.constant dense<0.000000e+00> : vector<128xf32>
    %39 = vector.multi_reduction <add>, %17#3, %cst_16 [0] : vector<8x128xf32> to vector<128xf32>
    %40 = vector.shape_cast %39 : vector<128xf32> to vector<1x128xf32>
    %41 = vector.broadcast %5 : f32 to vector<1x128xf32>
    %42 = arith.mulf %40, %41 : vector<1x128xf32>
    %c0_17 = arith.constant 0 : index
    %c3 = arith.constant 3 : index
    %c0_18 = arith.constant 0 : index
    %43 = vector.load %arg7[%c0_17, %c3, %c0_18] : memref<1x8x128xf32, #tpu.memory_space<vmem>>, vector<1x1x128xf32>
    %44 = vector.shape_cast %43 : vector<1x1x128xf32> to vector<1x128xf32>
    %45 = vector.shape_cast %42 : vector<1x128xf32> to vector<1x1x128xf32>
    tpu.vector_store %arg7[%c0_17, %c3, %c0_18], %45 {strides = array<i32>} : memref<1x8x128xf32, #tpu.memory_space<vmem>>, vector<1x1x128xf32>,
    %cst_19 = arith.constant dense<0.000000e+00> : vector<128xf32>
    %46 = vector.multi_reduction <add>, %17#4, %cst_19 [0] : vector<8x128xf32> to vector<128xf32>
    %47 = vector.shape_cast %46 : vector<128xf32> to vector<1x128xf32>
    %48 = vector.broadcast %5 : f32 to vector<1x128xf32>
    %49 = arith.mulf %47, %48 : vector<1x128xf32>
    %c0_20 = arith.constant 0 : index
    %c4 = arith.constant 4 : index
    %c0_21 = arith.constant 0 : index
    %50 = vector.load %arg7[%c0_20, %c4, %c0_21] : memref<1x8x128xf32, #tpu.memory_space<vmem>>, vector<1x1x128xf32>
    %51 = vector.shape_cast %50 : vector<1x1x128xf32> to vector<1x128xf32>
    %52 = vector.shape_cast %49 : vector<1x128xf32> to vector<1x1x128xf32>
    tpu.vector_store %arg7[%c0_20, %c4, %c0_21], %52 {strides = array<i32>} : memref<1x8x128xf32, #tpu.memory_space<vmem>>, vector<1x1x128xf32>,
    %cst_22 = arith.constant 0.000000e+00 : f32
    %53 = vector.broadcast %cst_22 : f32 to vector<3x128xf32>
    %c0_23 = arith.constant 0 : index
    %c5 = arith.constant 5 : index
    %c0_24 = arith.constant 0 : index
    %54 = vector.load %arg7[%c0_23, %c5, %c0_24] : memref<1x8x128xf32, #tpu.memory_space<vmem>>, vector<1x3x128xf32>
    %55 = vector.shape_cast %54 : vector<1x3x128xf32> to vector<3x128xf32>
    %56 = vector.shape_cast %53 : vector<3x128xf32> to vector<1x3x128xf32>
    tpu.vector_store %arg7[%c0_23, %c5, %c0_24], %56 {strides = array<i32>} : memref<1x8x128xf32, #tpu.memory_space<vmem>>, vector<1x3x128xf32>,
    return
  }
  func.func @transform_0(%arg0: i32, %arg1: memref<1xi32, #tpu.memory_space<smem>>, %arg2: memref<1xi32, #tpu.memory_space<smem>>) -> (i32, i32) {
    %0 = arith.index_cast %arg0 : i32 to index
    %1 = memref.load %arg1[%0] : memref<1xi32, #tpu.memory_space<smem>>
    %c0_i32 = arith.constant 0 : i32
    %c0_i32_0 = arith.constant 0 : i32
    return %1, %c0_i32 : i32, i32
  }
  func.func @transform_1(%arg0: i32, %arg1: memref<1xi32, #tpu.memory_space<smem>>, %arg2: memref<1xi32, #tpu.memory_space<smem>>) -> (i32, i32) {
    %0 = arith.index_cast %arg0 : i32 to index
    %1 = memref.load %arg1[%0] : memref<1xi32, #tpu.memory_space<smem>>
    %c0_i32 = arith.constant 0 : i32
    %c0_i32_0 = arith.constant 0 : i32
    return %1, %c0_i32 : i32, i32
  }
  func.func @transform_2(%arg0: i32, %arg1: memref<1xi32, #tpu.memory_space<smem>>, %arg2: memref<1xi32, #tpu.memory_space<smem>>) -> (i32, i32) {
    %0 = arith.index_cast %arg0 : i32 to index
    %1 = memref.load %arg2[%0] : memref<1xi32, #tpu.memory_space<smem>>
    %c0_i32 = arith.constant 0 : i32
    %c0_i32_0 = arith.constant 0 : i32
    return %c0_i32, %1 : i32, i32
  }
  func.func @transform_3(%arg0: i32, %arg1: memref<1xi32, #tpu.memory_space<smem>>, %arg2: memref<1xi32, #tpu.memory_space<smem>>) -> (i32, i32) {
    %0 = arith.index_cast %arg0 : i32 to index
    %1 = memref.load %arg2[%0] : memref<1xi32, #tpu.memory_space<smem>>
    %c0_i32 = arith.constant 0 : i32
    %c0_i32_0 = arith.constant 0 : i32
    return %c0_i32, %1 : i32, i32
  }
  func.func @transform_4(%arg0: i32, %arg1: memref<1xi32, #tpu.memory_space<smem>>, %arg2: memref<1xi32, #tpu.memory_space<smem>>) -> (i32, i32, i32) {
    %c0_i32 = arith.constant 0 : i32
    %c0_i32_0 = arith.constant 0 : i32
    %c0_i32_1 = arith.constant 0 : i32
    return %arg0, %c0_i32, %c0_i32_0 : i32, i32, i32
  }
}

</mosaic_0001>

<bundles_post_ra>
// kernel: tpu_custom_call.1
= control target key start
LH: loop header
LB: loop body
LE: loop exit
PB: predicated region body
PF: predicated region fallthrough
CT: control target
= control target key end

     0   :  { %13 = vsyncpa [#allocation6], 0  ;;  %v109_v0 = vlaneseq  ;;  %v1035_v10 = vmov 0.0   ;;  %v1037_v11 = vmov 0.0   ;;  %v1039_v12 = vmov 0.0   ;;  %s1254_s0 = inlined_call_operand.<no memory space> [shape: s32[1], index: 0, kind: input, shape index: {}]   ;;  %s1255_s1 = inlined_call_operand.<no memory space> [shape: s32[1], index: 1, kind: input, shape index: {}]   ;;  %s1256_s2 = inlined_call_operand.vmem [shape: f32[128,32], index: 2, kind: input, shape index: {}]   ;;  %s1257_s3 = inlined_call_operand.vmem [shape: f32[128,8], index: 3, kind: input, shape index: {}]   ;;  %s1258_s4 = inlined_call_operand.vmem [shape: f32[32,128], index: 4, kind: input, shape index: {}]   ;;  %s1259_s5 = inlined_call_operand.vmem [shape: f32[8,128], index: 5, kind: input, shape index: {}]   ;;  %s1260_s6 = inlined_call_operand.hbm [shape: f32[1,8,128], index: 6, kind: output, shape index: {}]  }
   0x1   :  { %s706_s23 = sshll.u32 %s1254_s0, 4  ;;  %p89_p0 = scmp.lt.s32.totalorder %s1255_s1, 0  ;;  %v1041_v13 = vmov 0.0   ;;  %v1043_v14 = vmov 0.0  }
   0x2   :  { %p74_p1 = scmp.lt.s32.totalorder %s706_s23, 15  ;;  %p102_p2 = scmp.eq.s32.totalorder %s1254_s0, %s1255_s1  ;;  %v110_v1 = vand.u32 127, %v109_v0  ;;  %v992_v2 = vshrl.u32 %v109_v0, 7 }
   0x3   :  { %s90_s8 = scalar_select %p89_p0, %s1255_s1, 0 }
   0x4   :  { %s1267_s23 = smov (!%p74_p1, %s706_s23), 15  ;;  %s712_s12 = sshll.u32 %s1255_s1, 7 }
   0x5   :  { %s710_s9 = sshll.u32 %s90_s8, 3  ;;  %s707_s13 = sshll.u32 %s1267_s23, 3  ;;  %v112_v3 = vstv %s712_s12 }
   0x6   :  { %s92_s16 = scalar_lea.vmem %s1258_s4, %s710_s9  ;;  %s1003_s19 = scalar_lea.vmem %s1256_s2, %s707_s13  ;;  %v1016_v7 = vadd.s32 %v112_v3, %v110_v1 }
   0x7   :  { %s1008_s22 = scalar_lea.vmem %s1257_s3, %s707_s13  ;;  %v1010_v4 = vld [vmem:[%s92_s16] sm:$0xff]  ;;  %v1012_v5 = vld [vmem:[%s92_s16 + $0x8] sm:$0xff]  ;;  %v1014_v6 = vld [vmem:[%s92_s16 + $0x10] sm:$0xff]  ;;  %s98_s24 = scalar_lea.vmem %s1259_s5, %s710_s9 }
   0x8   :  { %v1021_v8 = vld [vmem:[%s92_s16 + $0x18] sm:$0xff]  ;;  %s1030_s27 = scalar_select %p102_p2, 1.0, 2.0  ;;  %v1032_v9 = vld [vmem:[%s98_s24] sm:$0xff]  ;;  %vm114_vm0 = vcmp.lt.s32.totalorder %v1016_v7, 8 }
   0x9   :  { %s1045_s5 = smov 0  }
   0xa LB: > { %v908_v15 = vmov 2   ;;  %v909_v16 = vmov 0   ;;  %s1068_s1 = sshll.u32 %s906_s5, 3  ;;  %v910_v18 = vmov 3   ;;  %v911_v19 = vmov 1   ;;  %s714_s8 = sshll.u32 %s1254_s0, 7  ;;  %s906_s5 = sphi %s1045_s5, %s122_s5   ;;  %v902_v14 = vphi %v1043_v14, %v1265_v14   ;;  %v898_v13 = vphi %v1041_v13, %v1264_v13   ;;  %v894_v12 = vphi %v1039_v12, %v1263_v12   ;;  %v890_v11 = vphi %v1037_v11, %v1262_v11   ;;  %v886_v10 = vphi %v1035_v10, %v1261_v10  }
   0xb   : > { %799 = vset.pattern.permute.xlu1 %v908_v15  ;;  %797 = vset.pattern.permute.xlu0 %v909_v16  ;;  %s129_s28 = scalar_lea.vmem %s1003_s19, %s1068_s1  ;;  %v912_v20 = vmov 4   ;;  %v913_v21 = vmov 5   ;;  %v914_v22 = vmov 6   ;;  %v915_v23 = vmov 8   ;;  %s131_s29 = scalar_lea.vmem %s1008_s22, %s1068_s1 }
   0xc   : > { %v1072_v17 = vld [vmem:[%s129_s28] sm:$0xff]  ;;  %v916_v24 = vmov 7   ;;  %v917_v25 = vmov 11   ;;  %v918_v26 = vmov 9   ;;  %v919_v27 = vmov 14   ;;  %s587_s9 = sadd.s32 %s714_s8, %s1068_s1  ;;  %s122_s5 = sadd.s32 1, %s906_s5  }
   0xd   : > { %157 = vperm.xlu1 %799, %v1072_v17   ;;  %135 = vperm.xlu0 %797, %v1072_v17   ;;  %v920_v28 = vmov 10   ;;  %v921_v29 = vmov 17   ;;  %v922_v30 = vmov 12   ;;  %v923_v31 = vmov 20   ;;  %v132_v39 = vld [vmem:[%s131_s29] sm:$0xff]  ;;  %p119_p3 = scmp.ge.s32.totalorder %s122_s5, 16  }
   0xe   : > { %v924_v32 = vmov 13   ;;  %v925_v33 = vmov 23   ;;  %v926_v34 = vmov 15   ;;  %v927_v35 = vmov 26   ;;  %s941_s0 = smov (%p119_p3), [#allocation5]  }
   0xf   : > { %v928_v36 = vmov 16   ;;  %v929_v37 = vmov 27   ;;  %v930_v38 = vmov 18   ;;  %v931_v40 = vmov 19   ;;  %s650_s10 = sshll.u32 (%p119_p3), %s941_s0, 4  ;;  %s651_s10 = int_to_ptr.vmem [resolvable:$true] %s650_s10 }
  0x10   : > { %v932_v41 = vmov 30   ;;  %v933_v42 = vmov 21   ;;  %v934_v43 = vmov 22   ;;  %v935_v44 = vmov 24   ;;  %s838_s11 = scalar_lea.vmem (%p119_p3), %s651_s10, 128  ;;  %p843_p5 = scmp.lt.s32.totalorder (%p119_p3), %s651_s10, %s651_s10 }
  0x11   : > { %800 = vset.pattern.permute.xlu1 %v910_v18  ;;  %798 = vset.pattern.permute.xlu0 %v911_v19  ;;  %v936_v45 = vmov 25   ;;  %v937_v46 = vmov 28   ;;  %v938_v47 = vmov 29   ;;  %v939_v48 = vmov 31   ;;  %p839_p4 = scmp.ne.s32.totalorder (%p119_p3), %s651_s10, %s838_s11  ;;  %p844_p6 = scmp.lt.s32.totalorder (%p119_p3), %s838_s11, %s838_s11 }
  0x12   : > { %168 = vperm.xlu1 %800, %v1072_v17   ;;  %146 = vperm.xlu0 %798, %v1072_v17   ;;  %v1122_v52 = vsub.s32 0, %v992_v2  ;;  %v1125_v53 = vsub.s32 1, %v992_v2  ;;  %v1132_v58 = vsub.s32 2, %v992_v2  ;;  %v1137_v63 = vsub.s32 3, %v992_v2 }
  0x13   :  { %p845_p7 = por (%p119_p3), %p844_p6, %p843_p5 }
  0x14   : > { %v141_v55 = vrot.slane %v1010_v4, %v1122_v52  ;;  %v152_v56 = vrot.slane %v1010_v4, %v1125_v53  ;;  %v163_v62 = vrot.slane %v1010_v4, %v1132_v58 }
  0x15   :  { %p846_p8 = pnand (%p119_p3), %p845_p7, %p839_p4 }
  0x16   : > { %801 = vset.pattern.permute.xlu1 %v912_v20  ;;  %802 = vset.pattern.permute.xlu0 %v913_v21 }
  0x17   : > { %179 = vperm.xlu1 %801, %v1072_v17   ;;  %190 = vperm.xlu0 %802, %v1072_v17  }
  0x1b   : > { %803 = vset.pattern.permute.xlu1 %v914_v22  ;;  %805 = vset.pattern.permute.xlu0 %v915_v23 }
  0x1c   : > { %201 = vperm.xlu1 %803, %v1072_v17   ;;  %223 = vperm.xlu0 %805, %v1072_v17  }
  0x20   : > { %804 = vset.pattern.permute.xlu1 %v916_v24  ;;  %808 = vset.pattern.permute.xlu0 %v917_v25 }
  0x21   : > { %212 = vperm.xlu1 %804, %v1072_v17   ;;  %256 = vperm.xlu0 %808, %v1072_v17  }
  0x25   : > { %806 = vset.pattern.permute.xlu1 %v918_v26  ;;  %811 = vset.pattern.permute.xlu0 %v919_v27  ;;  %v1152_v27 = vsub.s32 6, %v992_v2 }
  0x26   : > { %234 = vperm.xlu1 %806, %v1072_v17   ;;  %289 = vperm.xlu0 %811, %v1072_v17  }
  0x2a   : > { %807 = vset.pattern.permute.xlu1 %v920_v28  ;;  %814 = vset.pattern.permute.xlu0 %v921_v29 }
  0x2b   : > { %245 = vperm.xlu1 %807, %v1072_v17   ;;  %322 = vperm.xlu0 %814, %v1072_v17  }
  0x2f   : > { %809 = vset.pattern.permute.xlu1 %v922_v30  ;;  %817 = vset.pattern.permute.xlu0 %v923_v31  ;;  %v1155_v31 = vsub.s32 7, %v992_v2 }
  0x30   : > { %267 = vperm.xlu1 %809, %v1072_v17   ;;  %355 = vperm.xlu0 %817, %v1072_v17  }
  0x34   : > { %810 = vset.pattern.permute.xlu1 %v924_v32  ;;  %820 = vset.pattern.permute.xlu0 %v925_v33 }
  0x35   : > { %278 = vperm.xlu1 %810, %v1072_v17   ;;  %388 = vperm.xlu0 %820, %v1072_v17  }
  0x39   : > { %812 = vset.pattern.permute.xlu1 %v926_v34  ;;  %823 = vset.pattern.permute.xlu0 %v927_v35  ;;  %v207_v35 = vrot.slane %v1010_v4, %v1152_v27 }
  0x3a   : > { %300 = vperm.xlu1 %812, %v1072_v17   ;;  %421 = vperm.xlu0 %823, %v1072_v17  }
  0x3e   : > { %813 = vset.pattern.permute.xlu1 %v928_v36  ;;  %826 = vset.pattern.permute.xlu0 %v929_v37  ;;  %v218_v36 = vrot.slane %v1010_v4, %v1155_v31 }
  0x3f   : > { %311 = vperm.xlu1 %813, %v1072_v17   ;;  %432 = vperm.xlu0 %826, %v1072_v17  }
  0x43   : > { %815 = vset.pattern.permute.xlu1 %v930_v38  ;;  %829 = vset.pattern.permute.xlu0 %v910_v18 }
  0x44   : > { %333 = vperm.xlu1 %815, %v1072_v17   ;;  %522 = vperm.xlu0 %829, %v132_v39  }
  0x48   : > { %816 = vset.pattern.permute.xlu1 %v931_v40  ;;  %832 = vset.pattern.permute.xlu0 %v932_v41 }
  0x49   : > { %344 = vperm.xlu1 %816, %v1072_v17   ;;  %465 = vperm.xlu0 %832, %v1072_v17  }
  0x4d   : > { %818 = vset.pattern.permute.xlu1 %v933_v42  ;;  %835 = vset.pattern.permute.xlu0 %v914_v22  ;;  %v229_v42 = vrot.slane %v1012_v5, %v1122_v52 }
  0x4e   : > { %366 = vperm.xlu1 %818, %v1072_v17   ;;  %555 = vperm.xlu0 %835, %v132_v39  }
  0x52   : > { %819 = vset.pattern.permute.xlu1 %v934_v43  ;;  %837 = vset.pattern.permute.xlu0 %v916_v24 }
  0x53   : > { %377 = vperm.xlu1 %819, %v1072_v17  }
  0x57   : > { %821 = vset.pattern.permute.xlu1 %v935_v44 }
  0x58   : > { %399 = vperm.xlu1 %821, %v1072_v17  }
  0x5c   : > { %822 = vset.pattern.permute.xlu1 %v936_v45 }
  0x5d   : > { %410 = vperm.xlu1 %822, %v1072_v17  }
  0x61   : > { %824 = vset.pattern.permute.xlu1 %v909_v16 }
  0x62   : > { %489 = vperm.xlu1 %824, %v132_v39  }
  0x66   : > { %825 = vset.pattern.permute.xlu1 %v911_v19 }
  0x67   : > { %500 = vperm.xlu1 %825, %v132_v39  }
  0x6b   : > { %827 = vset.pattern.permute.xlu1 %v908_v15  ;;  %v1140_v15 = vsub.s32 4, %v992_v2 }
  0x6c   : > { %511 = vperm.xlu1 %827, %v132_v39  }
  0x6d   : > { %v185_v19 = vrot.slane %v1010_v4, %v1140_v15 }
  0x70   : > { %828 = vset.pattern.permute.xlu1 %v937_v46 }
  0x71   : > { %443 = vperm.xlu1 %828, %v1072_v17  }
  0x75   : > { %830 = vset.pattern.permute.xlu1 %v938_v47 }
  0x76   : > { %454 = vperm.xlu1 %830, %v1072_v17  }
  0x7a   : > { %831 = vset.pattern.permute.xlu1 %v912_v20  ;;  %v1147_v20 = vsub.s32 5, %v992_v2 }
  0x7b   : > { %533 = vperm.xlu1 %831, %v132_v39  }
  0x7c   : > { %v196_v26 = vrot.slane %v1010_v4, %v1147_v20 }
  0x7f   : > { %833 = vset.pattern.permute.xlu1 %v913_v21 }
  0x80   : > { %544 = vperm.xlu1 %833, %v132_v39  }
  0x84   : > { %834 = vset.pattern.permute.xlu1 %v939_v48 }
  0x85   : > { %476 = vperm.xlu1 %834, %v1072_v17   ;;  %v174_v17 = vrot.slane %v1010_v4, %v1137_v63 }
  0x88   : > { %v158_v49 = vpop.permute.xlu1 %157  ;;  %v136_v51 = vpop.permute.xlu0 %135 }
  0x89   : > { %836 = vset.pattern.permute.xlu1 %v916_v24  ;;  %v142_v60 = vsub.f32 %v136_v51, %v141_v55  ;;  %v164_v16 = vsub.f32 %v158_v49, %v163_v62  ;;  %v240_v49 = vrot.slane %v1012_v5, %v1125_v53  ;;  %v251_v51 = vrot.slane %v1012_v5, %v1132_v58 }
  0x8a   : > { %566 = vperm.xlu1 %836, %v132_v39  }
  0x8b   : > { %v143_v1 = vand.u32 2147483647, %v142_v60  ;;  %v165_v22 = vand.u32 2147483647, %v164_v16  ;;  %v262_v60 = vrot.slane %v1012_v5, %v1137_v63 }
  0x8d   : > { %v169_v50 = vpop.permute.xlu1 %168  ;;  %v147_v57 = vpop.permute.xlu0 %146 }
  0x8e   : > { %v153_v61 = vsub.f32 %v147_v57, %v152_v56  ;;  %v175_v23 = vsub.f32 %v169_v50, %v174_v17  ;;  %v273_v17 = vrot.slane %v1012_v5, %v1140_v15 }
  0x90   : > { %v154_v3 = vand.u32 2147483647, %v153_v61  ;;  %v176_v30 = vand.u32 2147483647, %v175_v23 }
  0x92   : > { %v180_v54 = vpop.permute.xlu1 %179  ;;  %v155_v18 = vadd.f32 %v154_v3, %v143_v1  ;;  %v191_v28 = vpop.permute.xlu0 %190 }
  0x93   : > { %v186_v25 = vsub.f32 %v180_v54, %v185_v19  ;;  %v197_v34 = vsub.f32 %v191_v28, %v196_v26  ;;  %v284_v19 = vrot.slane %v1012_v5, %v1147_v20  ;;  %v295_v26 = vrot.slane %v1012_v5, %v1152_v27 }
  0x94   : > { %v166_v24 = vadd.f32 %v165_v22, %v155_v18 }
  0x95   : > { %v187_v33 = vand.u32 2147483647, %v186_v25  ;;  %v198_v39 = vand.u32 2147483647, %v197_v34 }
  0x96   : > { %v177_v32 = vadd.f32 %v176_v30, %v166_v24 }
  0x97   : > { %v202_v59 = vpop.permute.xlu1 %201  ;;  %v224_v43 = vpop.permute.xlu0 %223 }
  0x98   : > { %v188_v38 = vadd.f32 %v187_v33, %v177_v32  ;;  %v208_v40 = vsub.f32 %v202_v59, %v207_v35  ;;  %v230_v48 = vsub.f32 %v224_v43, %v229_v42  ;;  %v306_v35 = vrot.slane %v1012_v5, %v1155_v31 }
  0x99   : > { %v328_v43 = vrot.slane %v1014_v6, %v1125_v53 }
  0x9a   : > { %v199_v45 = vadd.f32 %v198_v39, %v188_v38  ;;  %v209_v46 = vand.u32 2147483647, %v208_v40  ;;  %v231_v56 = vand.u32 2147483647, %v230_v48  ;;  %v317_v38 = vrot.slane %v1014_v6, %v1122_v52 }
  0x9c   : > { %v213_v0 = vpop.permute.xlu1 %212  ;;  %v210_v50 = vadd.f32 %v209_v46, %v199_v45  ;;  %v257_v61 = vpop.permute.xlu0 %256 }
  0x9d   : > { %v219_v41 = vsub.f32 %v213_v0, %v218_v36  ;;  %v263_v16 = vsub.f32 %v257_v61, %v262_v60  ;;  %v361_v61 = vrot.slane %v1014_v6, %v1140_v15 }
  0x9f   : > { %v220_v47 = vand.u32 2147483647, %v219_v41 }
  0xa1   : > { %v235_v21 = vpop.permute.xlu1 %234  ;;  %v221_v55 = vadd.f32 %v220_v47, %v210_v50  ;;  %v290_v28 = vpop.permute.xlu0 %289  ;;  %v339_v50 = vrot.slane %v1014_v6, %v1132_v58 }
  0xa2   : > { %v241_v57 = vsub.f32 %v235_v21, %v240_v49  ;;  %v264_v21 = vand.u32 2147483647, %v263_v16  ;;  %v296_v34 = vsub.f32 %v290_v28, %v295_v26  ;;  %v394_v28 = vrot.slane %v1014_v6, %v1155_v31 }
  0xa3   : > { %v232_v0 = vadd.f32 %v231_v56, %v221_v55  ;;  %v350_v55 = vrot.slane %v1014_v6, %v1137_v63 }
  0xa4   : > { %v242_v1 = vand.u32 2147483647, %v241_v57 }
  0xa6   : > { %v246_v29 = vpop.permute.xlu1 %245  ;;  %v243_v18 = vadd.f32 %v242_v1, %v232_v0 }
  0xa7   : > { %v252_v59 = vsub.f32 %v246_v29, %v251_v51 }
  0xa9   : > { %v253_v3 = vand.u32 2147483647, %v252_v59 }
  0xab   : > { %v268_v37 = vpop.permute.xlu1 %267  ;;  %v254_v23 = vadd.f32 %v253_v3, %v243_v18  ;;  %v372_v18 = vrot.slane %v1014_v6, %v1147_v20 }
  0xac   : > { %v274_v24 = vsub.f32 %v268_v37, %v273_v17  ;;  %v297_v37 = vand.u32 2147483647, %v296_v34 }
  0xad   : > { %v265_v30 = vadd.f32 %v264_v21, %v254_v23  ;;  %v383_v23 = vrot.slane %v1014_v6, %v1152_v27 }
  0xae   : > { %v275_v32 = vand.u32 2147483647, %v274_v24 }
  0xb0   : > { %v279_v44 = vpop.permute.xlu1 %278  ;;  %v276_v36 = vadd.f32 %v275_v32, %v265_v30 }
  0xb1   : > { %v285_v25 = vsub.f32 %v279_v44, %v284_v19  ;;  %v323_v44 = vpop.permute.xlu0 %322 }
  0xb2   : > { %v329_v49 = vsub.f32 %v323_v44, %v328_v43 }
  0xb3   : > { %v286_v33 = vand.u32 2147483647, %v285_v25 }
  0xb5   : > { %v301_v54 = vpop.permute.xlu1 %300  ;;  %v287_v40 = vadd.f32 %v286_v33, %v276_v36  ;;  %v405_v36 = vrot.slane %v1021_v8, %v1122_v52 }
  0xb6   : > { %v307_v41 = vsub.f32 %v301_v54, %v306_v35  ;;  %v330_v54 = vand.u32 2147483647, %v329_v49  ;;  %v506_v49 = vrot.slane %v1032_v9, %v1125_v53 }
  0xb7   : > { %v298_v46 = vadd.f32 %v297_v37, %v287_v40  ;;  %v416_v40 = vrot.slane %v1021_v8, %v1125_v53 }
  0xb8   : > { %v308_v47 = vand.u32 2147483647, %v307_v41 }
  0xba   : > { %v312_v62 = vpop.permute.xlu1 %311  ;;  %v309_v51 = vadd.f32 %v308_v47, %v298_v46 }
  0xbb   : > { %v318_v42 = vsub.f32 %v312_v62, %v317_v38  ;;  %v356_v62 = vpop.permute.xlu0 %355 }
  0xbc   : > { %v362_v17 = vsub.f32 %v356_v62, %v361_v61 }
  0xbd   : > { %v319_v48 = vand.u32 2147483647, %v318_v42 }
  0xbf   : > { %v334_v22 = vpop.permute.xlu1 %333  ;;  %v320_v57 = vadd.f32 %v319_v48, %v309_v51 }
  0xc0   : > { %v340_v59 = vsub.f32 %v334_v22, %v339_v50  ;;  %v363_v22 = vand.u32 2147483647, %v362_v17 }
  0xc1   : > { %v331_v1 = vadd.f32 %v330_v54, %v320_v57  ;;  %v517_v54 = vrot.slane %v1032_v9, %v1132_v58 }
  0xc2   : > { %v341_v3 = vand.u32 2147483647, %v340_v59 }
  0xc4   : > { %v345_v29 = vpop.permute.xlu1 %344  ;;  %v342_v19 = vadd.f32 %v341_v3, %v331_v1  ;;  %v460_v3 = vrot.slane %v1021_v8, %v1147_v20 }
  0xc5   : > { %v351_v60 = vsub.f32 %v345_v29, %v350_v55  ;;  %v389_v29 = vpop.permute.xlu0 %388  ;;  %v438_v55 = vrot.slane %v1021_v8, %v1137_v63 }
  0xc6   : > { %v395_v35 = vsub.f32 %v389_v29, %v394_v28  ;;  %v471_v28 = vrot.slane %v1021_v8, %v1152_v27 }
  0xc7   : > { %v352_v16 = vand.u32 2147483647, %v351_v60  ;;  %v449_v60 = vrot.slane %v1021_v8, %v1140_v15 }
  0xc9   : > { %v367_v39 = vpop.permute.xlu1 %366  ;;  %v353_v24 = vadd.f32 %v352_v16, %v342_v19  ;;  %v422_v43 = vpop.permute.xlu0 %421 }
  0xca   : > { %v373_v25 = vsub.f32 %v367_v39, %v372_v18  ;;  %v396_v39 = vand.u32 2147483647, %v395_v35 }
  0xcb   : > { %v364_v32 = vadd.f32 %v363_v22, %v353_v24 }
  0xcc   : > { %v374_v33 = vand.u32 2147483647, %v373_v25 }
  0xcd   : > { %v433_v57 = vpop.permute.xlu0 %432 }
  0xce   : > { %v378_v45 = vpop.permute.xlu1 %377  ;;  %v375_v38 = vadd.f32 %v374_v33, %v364_v32  ;;  %v439_v1 = vsub.f32 %v433_v57, %v438_v55  ;;  %v588_v55 = vstv %s587_s9 }
  0xcf   : > { %v384_v26 = vsub.f32 %v378_v45, %v383_v23  ;;  %v427_v45 = vrot.slane %v1021_v8, %v1132_v58  ;;  %v539_v23 = vrot.slane %v1032_v9, %v1140_v15 }
  0xd0   : > { %v440_v25 = vand.u32 2147483647, %v439_v1 }
  0xd1   : > { %v385_v34 = vand.u32 2147483647, %v384_v26  ;;  %v428_v51 = vsub.f32 %v422_v43, %v427_v45  ;;  %v523_v18 = vpop.permute.xlu0 %522 }
  0xd3   : > { %v400_v56 = vpop.permute.xlu1 %399  ;;  %v386_v41 = vadd.f32 %v385_v34, %v375_v38  ;;  %v429_v53 = vand.u32 2147483647, %v428_v51 }
  0xd4   : > { %v406_v42 = vsub.f32 %v400_v56, %v405_v36  ;;  %v495_v56 = vrot.slane %v1032_v9, %v1122_v52  ;;  %v528_v52 = vrot.slane %v1032_v9, %v1137_v63  ;;  %v550_v63 = vrot.slane %v1032_v9, %v1147_v20 }
  0xd5   : > { %v397_v47 = vadd.f32 %v396_v39, %v386_v41  ;;  %v466_v32 = vpop.permute.xlu0 %465 }
  0xd6   : > { %v407_v48 = vand.u32 2147483647, %v406_v42  ;;  %v472_v38 = vsub.f32 %v466_v32, %v471_v28  ;;  %v561_v42 = vrot.slane %v1032_v9, %v1152_v27 }
  0xd8   : > { %v411_v0 = vpop.permute.xlu1 %410  ;;  %v408_v59 = vadd.f32 %v407_v48, %v397_v47  ;;  %v473_v47 = vand.u32 2147483647, %v472_v38 }
  0xd9   : > { %v417_v44 = vsub.f32 %v411_v0, %v416_v40  ;;  %v556_v20 = vpop.permute.xlu0 %555 }
  0xdb   : > { %v418_v50 = vand.u32 2147483647, %v417_v44  ;;  %v482_v44 = vrot.slane %v1021_v8, %v1155_v31 }
  0xdd   : > { %v490_v21 = vpop.permute.xlu1 %489  ;;  %v419_v0 = vadd.f32 %v418_v50, %v408_v59  ;;  %v562_v50 = vsub.f32 %v556_v20, %v561_v42 }
  0xde   : > { %v496_v16 = vsub.f32 %v490_v21, %v495_v56  ;;  %v529_v21 = vsub.f32 %v523_v18, %v528_v52 }
  0xdf   : > { %v430_v22 = vadd.f32 %v429_v53, %v419_v0 }
  0xe0   : > { %v497_v29 = vand.u32 2147483647, %v496_v16  ;;  %v530_v41 = vand.u32 2147483647, %v529_v21 }
  0xe1   : > { %v441_v36 = vadd.f32 %v440_v25, %v430_v22 }
  0xe2   : > { %v501_v30 = vpop.permute.xlu1 %500 }
  0xe3   : > { %v507_v62 = vsub.f32 %v501_v30, %v506_v49 }
  0xe5   : > { %v508_v58 = vand.u32 2147483647, %v507_v62  ;;  %v589_v62 = vadd.s32 %v588_v55, %v992_v2 }
  0xe7   : > { %v512_v37 = vpop.permute.xlu1 %511  ;;  %v509_v34 = vadd.f32 %v508_v58, %v497_v29  ;;  %vm590_vm1 = vcmp.lt.s32.totalorder %v589_v62, 8 }
  0xe8   : > { %v518_v17 = vsub.f32 %v512_v37, %v517_v54  ;;  %v572_v54 = vrot.slane %v1032_v9, %v1155_v31  ;;  %vm591_vm2 = vmand %vm590_vm1, %vm114_vm0  ;;  %v608_v9 = vstv (%p119_p3), %s1030_s27 }
  0xea   : > { %v519_v30 = vand.u32 2147483647, %v518_v17 }
  0xec   : > { %v444_v46 = vpop.permute.xlu1 %443  ;;  %v520_v37 = vadd.f32 %v519_v30, %v509_v34 }
  0xed   : > { %v450_v19 = vsub.f32 %v444_v46, %v449_v60 }
  0xee   : > { %v531_v48 = vadd.f32 %v530_v41, %v520_v37  ;;  %v940_v41 = vmov (%p119_p3), 0.0  }
  0xef   : > { %v451_v33 = vand.u32 2147483647, %v450_v19  ;;  %643 = vst [vmem:[#allocation5 + $0x5] sm:$0x7] (%p119_p3), %v940_v41 }
  0xf1   : > { %v455_v61 = vpop.permute.xlu1 %454  ;;  %v452_v43 = vadd.f32 %v451_v33, %v441_v36 }
  0xf2   : > { %v461_v26 = vsub.f32 %v455_v61, %v460_v3  ;;  %v563_v61 = vand.u32 2147483647, %v562_v50 }
  0xf4   : > { %v462_v15 = vand.u32 2147483647, %v461_v26 }
  0xf6   : > { %v534_v24 = vpop.permute.xlu1 %533  ;;  %v463_v46 = vadd.f32 %v462_v15, %v452_v43 }
  0xf7   : > { %v540_v35 = vsub.f32 %v534_v24, %v539_v23 }
  0xf8   : > { %v474_v27 = vadd.f32 %v473_v47, %v463_v46 }
  0xf9   : > { %v541_v45 = vand.u32 2147483647, %v540_v35 }
  0xfb   : > { %v545_v40 = vpop.permute.xlu1 %544  ;;  %v542_v56 = vadd.f32 %v541_v45, %v531_v48 }
  0xfc   : > { %v551_v39 = vsub.f32 %v545_v40, %v550_v63 }
  0xfe   : > { %v552_v49 = vand.u32 2147483647, %v551_v39 }
 0x100   : > { %v477_v51 = vpop.permute.xlu1 %476  ;;  %v553_v60 = vadd.f32 %v552_v49, %v542_v56 }
 0x101   : > { %v483_v57 = vsub.f32 %v477_v51, %v482_v44 }
 0x102   : > { %v564_v16 = vadd.f32 %v563_v61, %v553_v60 }
 0x103   : > { %v484_v59 = vand.u32 2147483647, %v483_v57 }
 0x105   : > { %v485_v0 = vadd.f32 %v484_v59, %v474_v27  ;;  %v567_v53 = vpop.permute.xlu1 %566 }
 0x106   : > { %v573_v1 = vsub.f32 %v567_v53, %v572_v54 }
 0x107   : > { %v486_v3 = vmul.f32 0.04, %v485_v0 }
 0x108   : > { %v574_v17 = vand.u32 2147483647, %v573_v1 }
 0x109   : > { %v577_v52 = vand.u32 2147483647, %v486_v3  ;;  %vm576_vm4 = vcmp.ne.f32.partialorder %v486_v3, %v486_v3 }
 0x10a   : > { %v575_v18 = vadd.f32 %v574_v17, %v564_v16 }
 0x10b   : > { %vm578_vm3 = vcmp.eq.f32.partialorder %v577_v52, inf }
 0x10c   : > { %v579_v31 = vsel %vm578_vm3, 1000.0, %v486_v3  ;;  %v582_v19 = vand.u32 2147483647, %v575_v18  ;;  %vm581_vm6 = vcmp.ne.f32.partialorder %v575_v18, %v575_v18 }
 0x10d   : > { %v580_v58 = vsel %vm576_vm4, 0.0, %v579_v31 }
 0x10e   : > { %v592_v23 = vsel %vm591_vm2, %v580_v58, 0.0  ;;  %vm583_vm5 = vcmp.eq.f32.partialorder %v582_v19, inf }
 0x10f   : > { %v594_v24 = vadd.f32 %v902_v14, %v592_v23   ;;  %v596_v22 = vmul.f32 %v592_v23, %v592_v23  ;;  %v584_v25 = vsel %vm583_vm5, 1000.0, %v575_v18 }
 0x110   : > { %v585_v26 = vsel %vm581_vm6, 0.0, %v584_v25 }
 0x111   : > { %v597_v28 = vadd.f32 %v894_v12, %v596_v22   ;;  %v593_v29 = vsel %vm591_vm2, %v585_v26, 0.0  ;;  %v1265_v14 = vmov %v594_v24 }
 0x112   : > { %v595_v30 = vadd.f32 %v898_v13, %v593_v29   ;;  %v598_v21 = vmul.f32 %v593_v29, %v593_v29  ;;  %v600_v32 = vmul.f32 %v593_v29, %v592_v23  ;;  %121 = sbr.rel (!%p119_p3) target bundleno = 10 (0xa), region = 57  ;;  %v602_v14 = vrot.slane (%p119_p3), %v594_v24, 4 }
 0x113   : > { %v1263_v12 = vmov %v597_v28  ;;  %v619_v35 = vrot.slane (%p119_p3), %v597_v28, 4 }
 0x114   : > { %v599_v63 = vadd.f32 %v890_v11, %v598_v21   ;;  %v601_v33 = vadd.f32 %v886_v10, %v600_v32   ;;  %v1264_v13 = vmov %v595_v30  ;;  %v611_v34 = vrot.slane (%p119_p3), %v595_v30, 4 }
 0x115   :  { %v603_v38 = vadd.f32 (%p119_p3), %v602_v14, %v594_v24  ;;  %v620_v37 = vadd.f32 (%p119_p3), %v619_v35, %v597_v28 }
 0x116   : > { %v1261_v10 = vmov %v601_v33  ;;  %v1262_v11 = vmov %v599_v63  ;;  %v627_v36 = vrot.slane (%p119_p3), %v599_v63, 4  ;;  %v635_v15 = vrot.slane (%p119_p3), %v601_v33, 4 }
 0x117   :  { %v612_v40 = vadd.f32 %v611_v34, %v595_v30  ;;  %v604_v43 = vrot.slane %v603_v38, 2  ;;  %v621_v44 = vrot.slane %v620_v37, 2 }
 0x118   :  { %v628_v39 = vadd.f32 %v627_v36, %v599_v63  ;;  %v636_v42 = vadd.f32 %v635_v15, %v601_v33 }
 0x119   :  { %v613_v20 = vrot.slane %v612_v40, 2  ;;  %v605_v47 = vadd.f32 %v604_v43, %v603_v38  ;;  %v622_v2 = vadd.f32 %v621_v44, %v620_v37 }
 0x11a   :  { %v629_v45 = vrot.slane %v628_v39, 2  ;;  %v637_v46 = vrot.slane %v636_v42, 2 }
 0x11b   :  { %v614_v48 = vadd.f32 %v613_v20, %v612_v40  ;;  %v606_v6 = vrot.slane %v605_v47, 1  ;;  %v623_v8 = vrot.slane %v622_v2, 1 }
 0x11c   :  { %v630_v4 = vadd.f32 %v629_v45, %v628_v39  ;;  %v638_v5 = vadd.f32 %v637_v46, %v636_v42 }
 0x11d   :  { %v615_v7 = vrot.slane %v614_v48, 1  ;;  %v607_v12 = vadd.f32 %v606_v6, %v605_v47  ;;  %v624_v49 = vadd.f32 %v623_v8, %v622_v2 }
 0x11e   :  { %v631_v10 = vrot.slane %v630_v4, 1  ;;  %v639_v11 = vrot.slane %v638_v5, 1 }
 0x11f   :  { %v616_v13 = vadd.f32 %v615_v7, %v614_v48  ;;  %v609_v55 = vmul.f32 %v608_v9, %v607_v12  ;;  %v625_v56 = vmul.f32 %v624_v49, %v608_v9 }
 0x120   :  { %v632_v50 = vadd.f32 %v631_v10, %v630_v4  ;;  %v640_v51 = vadd.f32 %v639_v11, %v638_v5 }
 0x121   :  { %v617_v57 = vmul.f32 %v616_v13, %v608_v9  ;;  %610 = vst [vmem:[#allocation5] sm:$0x1] %v609_v55  ;;  %626 = vst [vmem:[#allocation5 + $0x2] sm:$0x1] %v625_v56 }
 0x122   :  { %v633_v54 = vmul.f32 %v632_v50, %v608_v9  ;;  %v641_v27 = vmul.f32 %v640_v51, %v608_v9 }
 0x123   :  { %618 = vst [vmem:[#allocation5 + $0x1] sm:$0x1] %v617_v57 }
 0x124   :  { %634 = vst [vmem:[#allocation5 + $0x3] sm:$0x1] %v633_v54  ;;  %642 = vst [vmem:[#allocation5 + $0x4] sm:$0x1] %v641_v27 }
 0x125   :  { %849 = shalt.err (!%p846_p8)
}
 0x126   :  { %653 = dma.vmem_to_hbm [thread:$0]  %s651_s10, 128, %s1260_s6, [#allocation6]  }
 0x127   :  { %882 = dma.done.wait [#allocation6], 128  }
 0x128   :  { %883 = vsyncadd [#allocation6], 4294967168 }
 0x129   :  { %657 = vsyncpa [#allocation6], 1 }

</bundles_post_ra>
